<compile_context>
chip_gen: v7x
topology: tpu7x:2x2x1
jax: 0.10.0
libtpu: 0.0.40
codegen_flags: <defaults>
</compile_context>

<pallas_src>
import jax
import jax.numpy as jnp
from jax.experimental import pallas as pl
from jax.experimental.pallas import tpu as pltpu


def affine_kernel(w_ref, b_ref, x_ref, o_ref):
    """One batch tile of the collapsed RoomClassifierFull forward.

    w_ref: (6, 3) f32 in SMEM  -- W_eff = w1 @ w2 @ w4
    b_ref: (3,)   f32 in SMEM  -- collapsed bias
    x_ref: (6, TB) f32 in VMEM -- inputs, batch on the lane axis
    o_ref: (3, TB) f32 in VMEM -- outputs, batch on the lane axis
    """
    # Load the 6 feature rows once; each is a fully lane-dense (1, TB) vector.
    xr = [x_ref[k:k + 1, :] for k in range(6)]

    # 3 output rows = 18 scalar-broadcast FMAs on the VPU (no MXU round-trip).
    # Fully unrolled; SMEM scalar loads co-issue with the VPU slots.
    for j in range(3):
        acc = xr[0] * w_ref[0, j] + b_ref[j]
        for k in range(1, 6):
            acc = acc + xr[k] * w_ref[k, j]
        o_ref[j:j + 1, :] = acc


def room_classifier_forward(x, params, *, tb=1024):
    """x: (B, 6) float. params: dict of w1,b1,w2,b2,w4,b4 (weights stored (in,out))."""
    w1, b1 = params["w1"], params["b1"]
    w2, b2 = params["w2"], params["b2"]
    w4, b4 = params["w4"], params["b4"]

    # Exact collapse of the activation-free linear chain (dropout = identity in eval).
    w_eff = (w1 @ w2 @ w4).astype(jnp.float32)                          # (6, 3)
    b_eff = ((b1 @ w2 + b2) @ w4 + b4).reshape(3).astype(jnp.float32)   # (3,)

    B = x.shape[0]

    # Lane-aligned padded batch; clamp the tile so small batches run one step
    # and aren't padded past the next 128 boundary.
    tb = max(128, (tb // 128) * 128)
    bp128 = pl.cdiv(B, 128) * 128
    if bp128 <= tb:
        tb = bp128
    bp = pl.cdiv(bp128, tb) * tb

    # Wrapper-side layout plumbing: batch-on-lanes (features, batch), padded
    # up to a whole number of batch tiles.
    x_t = jnp.pad(x.astype(jnp.float32).T, ((0, 0), (0, bp - B)))

    out_t = pl.pallas_call(
        affine_kernel,
        out_shape=jax.ShapeDtypeStruct((3, bp), jnp.float32),
        grid=(bp // tb,),
        in_specs=[
            pl.BlockSpec(memory_space=pltpu.MemorySpace.SMEM),   # W_eff scalars
            pl.BlockSpec(memory_space=pltpu.MemorySpace.SMEM),   # b_eff scalars
            pl.BlockSpec((6, tb), lambda i: (0, i)),             # batch tile of x
        ],
        out_specs=pl.BlockSpec((3, tb), lambda i: (0, i)),
        compiler_params=pltpu.CompilerParams(
            dimension_semantics=("parallel",)),                  # 2 TCs on v7x
    )(w_eff, b_eff, x_t)

    return out_t[:, :B].T


def init_params(key):
    """Deterministic init mimicking nn.Linear default (uniform(-1/sqrt(in), 1/sqrt(in)))."""
    def linear_init(key, fan_in, fan_out):
        kw, kb = jax.random.split(key)
        bound = 1.0 / jnp.sqrt(fan_in)
        # Stored as (in, out) so y = x @ W + b.
        w = jax.random.uniform(kw, (fan_in, fan_out), jnp.float32, -bound, bound)
        b = jax.random.uniform(kb, (1, fan_out), jnp.float32, -bound, bound)
        return w, b

    k1, k2, k4 = jax.random.split(key, 3)
    w1, b1 = linear_init(k1, 6, 12)
    w2, b2 = linear_init(k2, 12, 12)
    w4, b4 = linear_init(k4, 12, 3)
    return {"w1": w1, "b1": b1, "w2": w2, "b2": b2, "w4": w4, "b4": b4}


def reference_forward(x, params):
    h1 = x @ params["w1"] + params["b1"]
    h2 = h1 @ params["w2"] + params["b2"]
    # Dropout in eval mode is identity.
    return h2 @ params["w4"] + params["b4"]


if __name__ == "__main__":
    key = jax.random.PRNGKey(0)
    kx, kp = jax.random.split(key)

    B = 200  # small batch, deliberately not a tile multiple (exercises padding)
    x = jax.random.normal(kx, (B, 6), dtype=jnp.float32)
    params = init_params(kp)

    out = jax.block_until_ready(room_classifier_forward(x, params))

    ref = reference_forward(x, params)
    assert out.shape == (B, 3)
    assert jnp.allclose(out, ref, atol=1e-4, rtol=1e-4), "mismatch vs reference"

    print("KERNEL_OK")
</pallas_src>

<mosaic_0001>
module attributes {stable_mosaic.version = 11 : i64} {
  func.func @affine_kernel(%arg0: i32, %arg1: memref<6x3xf32, #tpu.memory_space<smem>>, %arg2: memref<3xf32, #tpu.memory_space<smem>>, %arg3: memref<6x256xf32, #tpu.memory_space<vmem>>, %arg4: memref<3x256xf32, #tpu.memory_space<vmem>>) attributes {dimension_semantics = [#tpu.dimension_semantics<parallel>], iteration_bounds = array<i64: 1>, scalar_prefetch = 0 : i64, scratch_operands = 0 : i64, tpu.core_type = #tpu.core_type<tc>, window_params = [{transform_indices = @transform_0, window_bounds = array<i64: 6, 3>}, {transform_indices = @transform_1, window_bounds = array<i64: 3>}, {transform_indices = @transform_2, window_bounds = array<i64: 6, 256>}, {transform_indices = @transform_3, window_bounds = array<i64: 3, 256>}]} {
    %c0 = arith.constant 0 : index
    %c0_0 = arith.constant 0 : index
    %0 = vector.load %arg3[%c0, %c0_0] : memref<6x256xf32, #tpu.memory_space<vmem>>, vector<1x256xf32>
    %c1 = arith.constant 1 : index
    %c0_1 = arith.constant 0 : index
    %1 = vector.load %arg3[%c1, %c0_1] : memref<6x256xf32, #tpu.memory_space<vmem>>, vector<1x256xf32>
    %c2 = arith.constant 2 : index
    %c0_2 = arith.constant 0 : index
    %2 = vector.load %arg3[%c2, %c0_2] : memref<6x256xf32, #tpu.memory_space<vmem>>, vector<1x256xf32>
    %c3 = arith.constant 3 : index
    %c0_3 = arith.constant 0 : index
    %3 = vector.load %arg3[%c3, %c0_3] : memref<6x256xf32, #tpu.memory_space<vmem>>, vector<1x256xf32>
    %c4 = arith.constant 4 : index
    %c0_4 = arith.constant 0 : index
    %4 = vector.load %arg3[%c4, %c0_4] : memref<6x256xf32, #tpu.memory_space<vmem>>, vector<1x256xf32>
    %c5 = arith.constant 5 : index
    %c0_5 = arith.constant 0 : index
    %5 = vector.load %arg3[%c5, %c0_5] : memref<6x256xf32, #tpu.memory_space<vmem>>, vector<1x256xf32>
    %c0_6 = arith.constant 0 : index
    %c0_7 = arith.constant 0 : index
    %6 = memref.load %arg1[%c0_6, %c0_7] : memref<6x3xf32, #tpu.memory_space<smem>>
    %7 = vector.broadcast %6 : f32 to vector<1x256xf32>
    %8 = arith.mulf %0, %7 : vector<1x256xf32>
    %c0_8 = arith.constant 0 : index
    %9 = memref.load %arg2[%c0_8] : memref<3xf32, #tpu.memory_space<smem>>
    %10 = vector.broadcast %9 : f32 to vector<1x256xf32>
    %11 = arith.addf %8, %10 : vector<1x256xf32>
    %c1_9 = arith.constant 1 : index
    %c0_10 = arith.constant 0 : index
    %12 = memref.load %arg1[%c1_9, %c0_10] : memref<6x3xf32, #tpu.memory_space<smem>>
    %13 = vector.broadcast %12 : f32 to vector<1x256xf32>
    %14 = arith.mulf %1, %13 : vector<1x256xf32>
    %15 = arith.addf %11, %14 : vector<1x256xf32>
    %c2_11 = arith.constant 2 : index
    %c0_12 = arith.constant 0 : index
    %16 = memref.load %arg1[%c2_11, %c0_12] : memref<6x3xf32, #tpu.memory_space<smem>>
    %17 = vector.broadcast %16 : f32 to vector<1x256xf32>
    %18 = arith.mulf %2, %17 : vector<1x256xf32>
    %19 = arith.addf %15, %18 : vector<1x256xf32>
    %c3_13 = arith.constant 3 : index
    %c0_14 = arith.constant 0 : index
    %20 = memref.load %arg1[%c3_13, %c0_14] : memref<6x3xf32, #tpu.memory_space<smem>>
    %21 = vector.broadcast %20 : f32 to vector<1x256xf32>
    %22 = arith.mulf %3, %21 : vector<1x256xf32>
    %23 = arith.addf %19, %22 : vector<1x256xf32>
    %c4_15 = arith.constant 4 : index
    %c0_16 = arith.constant 0 : index
    %24 = memref.load %arg1[%c4_15, %c0_16] : memref<6x3xf32, #tpu.memory_space<smem>>
    %25 = vector.broadcast %24 : f32 to vector<1x256xf32>
    %26 = arith.mulf %4, %25 : vector<1x256xf32>
    %27 = arith.addf %23, %26 : vector<1x256xf32>
    %c5_17 = arith.constant 5 : index
    %c0_18 = arith.constant 0 : index
    %28 = memref.load %arg1[%c5_17, %c0_18] : memref<6x3xf32, #tpu.memory_space<smem>>
    %29 = vector.broadcast %28 : f32 to vector<1x256xf32>
    %30 = arith.mulf %5, %29 : vector<1x256xf32>
    %31 = arith.addf %27, %30 : vector<1x256xf32>
    %c0_19 = arith.constant 0 : index
    %c0_20 = arith.constant 0 : index
    %32 = vector.load %arg4[%c0_19, %c0_20] : memref<3x256xf32, #tpu.memory_space<vmem>>, vector<1x256xf32>
    tpu.vector_store %arg4[%c0_19, %c0_20], %31 {strides = array<i32>} : memref<3x256xf32, #tpu.memory_space<vmem>>, vector<1x256xf32>,
    %c0_21 = arith.constant 0 : index
    %c1_22 = arith.constant 1 : index
    %33 = memref.load %arg1[%c0_21, %c1_22] : memref<6x3xf32, #tpu.memory_space<smem>>
    %34 = vector.broadcast %33 : f32 to vector<1x256xf32>
    %35 = arith.mulf %0, %34 : vector<1x256xf32>
    %c1_23 = arith.constant 1 : index
    %36 = memref.load %arg2[%c1_23] : memref<3xf32, #tpu.memory_space<smem>>
    %37 = vector.broadcast %36 : f32 to vector<1x256xf32>
    %38 = arith.addf %35, %37 : vector<1x256xf32>
    %c1_24 = arith.constant 1 : index
    %c1_25 = arith.constant 1 : index
    %39 = memref.load %arg1[%c1_24, %c1_25] : memref<6x3xf32, #tpu.memory_space<smem>>
    %40 = vector.broadcast %39 : f32 to vector<1x256xf32>
    %41 = arith.mulf %1, %40 : vector<1x256xf32>
    %42 = arith.addf %38, %41 : vector<1x256xf32>
    %c2_26 = arith.constant 2 : index
    %c1_27 = arith.constant 1 : index
    %43 = memref.load %arg1[%c2_26, %c1_27] : memref<6x3xf32, #tpu.memory_space<smem>>
    %44 = vector.broadcast %43 : f32 to vector<1x256xf32>
    %45 = arith.mulf %2, %44 : vector<1x256xf32>
    %46 = arith.addf %42, %45 : vector<1x256xf32>
    %c3_28 = arith.constant 3 : index
    %c1_29 = arith.constant 1 : index
    %47 = memref.load %arg1[%c3_28, %c1_29] : memref<6x3xf32, #tpu.memory_space<smem>>
    %48 = vector.broadcast %47 : f32 to vector<1x256xf32>
    %49 = arith.mulf %3, %48 : vector<1x256xf32>
    %50 = arith.addf %46, %49 : vector<1x256xf32>
    %c4_30 = arith.constant 4 : index
    %c1_31 = arith.constant 1 : index
    %51 = memref.load %arg1[%c4_30, %c1_31] : memref<6x3xf32, #tpu.memory_space<smem>>
    %52 = vector.broadcast %51 : f32 to vector<1x256xf32>
    %53 = arith.mulf %4, %52 : vector<1x256xf32>
    %54 = arith.addf %50, %53 : vector<1x256xf32>
    %c5_32 = arith.constant 5 : index
    %c1_33 = arith.constant 1 : index
    %55 = memref.load %arg1[%c5_32, %c1_33] : memref<6x3xf32, #tpu.memory_space<smem>>
    %56 = vector.broadcast %55 : f32 to vector<1x256xf32>
    %57 = arith.mulf %5, %56 : vector<1x256xf32>
    %58 = arith.addf %54, %57 : vector<1x256xf32>
    %c1_34 = arith.constant 1 : index
    %c0_35 = arith.constant 0 : index
    %59 = vector.load %arg4[%c1_34, %c0_35] : memref<3x256xf32, #tpu.memory_space<vmem>>, vector<1x256xf32>
    tpu.vector_store %arg4[%c1_34, %c0_35], %58 {strides = array<i32>} : memref<3x256xf32, #tpu.memory_space<vmem>>, vector<1x256xf32>,
    %c0_36 = arith.constant 0 : index
    %c2_37 = arith.constant 2 : index
    %60 = memref.load %arg1[%c0_36, %c2_37] : memref<6x3xf32, #tpu.memory_space<smem>>
    %61 = vector.broadcast %60 : f32 to vector<1x256xf32>
    %62 = arith.mulf %0, %61 : vector<1x256xf32>
    %c2_38 = arith.constant 2 : index
    %63 = memref.load %arg2[%c2_38] : memref<3xf32, #tpu.memory_space<smem>>
    %64 = vector.broadcast %63 : f32 to vector<1x256xf32>
    %65 = arith.addf %62, %64 : vector<1x256xf32>
    %c1_39 = arith.constant 1 : index
    %c2_40 = arith.constant 2 : index
    %66 = memref.load %arg1[%c1_39, %c2_40] : memref<6x3xf32, #tpu.memory_space<smem>>
    %67 = vector.broadcast %66 : f32 to vector<1x256xf32>
    %68 = arith.mulf %1, %67 : vector<1x256xf32>
    %69 = arith.addf %65, %68 : vector<1x256xf32>
    %c2_41 = arith.constant 2 : index
    %c2_42 = arith.constant 2 : index
    %70 = memref.load %arg1[%c2_41, %c2_42] : memref<6x3xf32, #tpu.memory_space<smem>>
    %71 = vector.broadcast %70 : f32 to vector<1x256xf32>
    %72 = arith.mulf %2, %71 : vector<1x256xf32>
    %73 = arith.addf %69, %72 : vector<1x256xf32>
    %c3_43 = arith.constant 3 : index
    %c2_44 = arith.constant 2 : index
    %74 = memref.load %arg1[%c3_43, %c2_44] : memref<6x3xf32, #tpu.memory_space<smem>>
    %75 = vector.broadcast %74 : f32 to vector<1x256xf32>
    %76 = arith.mulf %3, %75 : vector<1x256xf32>
    %77 = arith.addf %73, %76 : vector<1x256xf32>
    %c4_45 = arith.constant 4 : index
    %c2_46 = arith.constant 2 : index
    %78 = memref.load %arg1[%c4_45, %c2_46] : memref<6x3xf32, #tpu.memory_space<smem>>
    %79 = vector.broadcast %78 : f32 to vector<1x256xf32>
    %80 = arith.mulf %4, %79 : vector<1x256xf32>
    %81 = arith.addf %77, %80 : vector<1x256xf32>
    %c5_47 = arith.constant 5 : index
    %c2_48 = arith.constant 2 : index
    %82 = memref.load %arg1[%c5_47, %c2_48] : memref<6x3xf32, #tpu.memory_space<smem>>
    %83 = vector.broadcast %82 : f32 to vector<1x256xf32>
    %84 = arith.mulf %5, %83 : vector<1x256xf32>
    %85 = arith.addf %81, %84 : vector<1x256xf32>
    %c2_49 = arith.constant 2 : index
    %c0_50 = arith.constant 0 : index
    %86 = vector.load %arg4[%c2_49, %c0_50] : memref<3x256xf32, #tpu.memory_space<vmem>>, vector<1x256xf32>
    tpu.vector_store %arg4[%c2_49, %c0_50], %85 {strides = array<i32>} : memref<3x256xf32, #tpu.memory_space<vmem>>, vector<1x256xf32>,
    return
  }
  func.func @transform_0(%arg0: i32) -> (i32, i32) {
    %c0_i32 = arith.constant 0 : i32
    %c0_i32_0 = arith.constant 0 : i32
    %c0_i32_1 = arith.constant 0 : i32
    return %c0_i32, %c0_i32_0 : i32, i32
  }
  func.func @transform_1(%arg0: i32) -> i32 {
    %c0_i32 = arith.constant 0 : i32
    %c0_i32_0 = arith.constant 0 : i32
    return %c0_i32 : i32
  }
  func.func @transform_2(%arg0: i32) -> (i32, i32) {
    %c0_i32 = arith.constant 0 : i32
    %c0_i32_0 = arith.constant 0 : i32
    return %c0_i32, %arg0 : i32, i32
  }
  func.func @transform_3(%arg0: i32) -> (i32, i32) {
    %c0_i32 = arith.constant 0 : i32
    %c0_i32_0 = arith.constant 0 : i32
    return %c0_i32, %arg0 : i32, i32
  }
}

</mosaic_0001>

<bundles_post_ra>
// kernel: tpu_custom_call.1
= control target key start
LH: loop header
LB: loop body
LE: loop exit
PB: predicated region body
PF: predicated region fallthrough
CT: control target
= control target key end

     0   :  { %8 = vsyncpa [#allocation4], 0  ;;  %s361_s0 = inlined_call_operand.vmem [shape: f32[6,3], index: 0, kind: input, shape index: {}]   ;;  %s362_s1 = inlined_call_operand.vmem [shape: f32[3], index: 1, kind: input, shape index: {}]   ;;  %s363_s2 = inlined_call_operand.vmem [shape: f32[6,256], index: 2, kind: input, shape index: {}]   ;;  %s364_s3 = inlined_call_operand.hbm [shape: f32[3,256], index: 3, kind: output, shape index: {}]  }
   0x1   :  { %9 = vsyncpa [#allocation6], 0 }
   0x2   :  { %10 = vsyncpa [#allocation3], 0  ;;  %s17_s14 = sshll.u32 %s361_s0, 4  ;;  %s27_s17 = sshll.u32 %s362_s1, 4  ;;  %s18_s14 = int_to_ptr.vmem [resolvable:$true] %s17_s14  ;;  %s28_s17 = int_to_ptr.vmem [resolvable:$true] %s27_s17 }
   0x3   :  { %s181_s18 = scalar_lea.vmem %s18_s14, 128  ;;  %p186_p1 = scmp.lt.s32.totalorder %s18_s14, %s18_s14 }
   0x4   :  { %p182_p0 = scmp.ne.s32.totalorder %s18_s14, %s181_s18  ;;  %p187_p2 = scmp.lt.s32.totalorder %s181_s18, %s181_s18 }
   0x6   :  { %p188_p3 = por %p187_p2, %p186_p1 }
   0x8   :  { %p189_p4 = pnand %p188_p3, %p182_p0 }
   0xa   :  { %192 = shalt.err (!%p189_p4)
}
   0xb   :  { %s233_s19 = smov [#allocation2]   ;;  %s193_s20 = scalar_lea.vmem %s28_s17, 16 }
   0xc   :  { %20 = dma.vmem_to_smem %s18_s14, 128, %s233_s19, [#allocation4]  }
   0xd   :  { %p194_p5 = scmp.ne.s32.totalorder %s28_s17, %s193_s20  ;;  %p198_p6 = scmp.lt.s32.totalorder %s28_s17, %s28_s17 }
   0xe   :  { %p199_p7 = scmp.lt.s32.totalorder %s193_s20, %s193_s20 }
  0x10   :  { %p200_p8 = por %p199_p7, %p198_p6 }
  0x12   :  { %p201_p9 = pnand %p200_p8, %p194_p5 }
  0x14   :  { %204 = shalt.err (!%p201_p9)
}
  0x15   :  { %s234_s0 = smov [#allocation5]  }
  0x16   :  { %30 = dma.vmem_to_smem %s28_s17, 16, %s234_s0, [#allocation6]  }
  0x17   :  { %227 = dma.done.wait [#allocation4], 128  }
  0x18   :  { %228 = vsyncadd [#allocation4], 4294967168 }
  0x19   :  { %229 = dma.done.wait [#allocation6], 16  }
  0x1a   :  { %230 = vsyncadd [#allocation6], 4294967280 }
  0x1b   :  { %39 = sfence }
  0x1c   :  { %s51_s1 = sld [smem:[#allocation2]]  ;;  %v40_v0 = vld [vmem:[%s363_s2] ss:$8 sm:$0x3]  ;;  %s276_s4 = sld [smem:[#allocation2 + $0x1]]  ;;  %v77_v12 = vlaneseq }
  0x1d   :  { %s262_s21 = sld [smem:[#allocation5]]  ;;  %v154_v1 = vld [vmem:[%s363_s2 + $0x1] ss:$8 sm:$0x3]  ;;  %s281_s7 = sld [smem:[#allocation5 + $0x1]] }
  0x1e   :  { %s159_s22 = sld [smem:[#allocation2 + $0x80]]  ;;  %v155_v2 = vld [vmem:[%s363_s2 + $0x2] ss:$8 sm:$0x3]  ;;  %s283_s8 = sld [smem:[#allocation2 + $0x81]]  ;;  %vm336_vm0 = vcmp.lt.s32.totalorder %v77_v12, 256 }
  0x1f   :  { %s160_s23 = sld [smem:[#allocation2 + $0x100]]  ;;  %v288_v3 = vld [vmem:[%s363_s2 + $0x3] ss:$8 sm:$0x3]  ;;  %s290_s11 = sld [smem:[#allocation2 + $0x101]] }
  0x20   :  { %s267_s26 = sld [smem:[#allocation2 + $0x180]]  ;;  %s292_s12 = sld [smem:[#allocation2 + $0x181]]  ;;  %v157_v6 = vld [vmem:[%s363_s2 + $0x4] ss:$8 sm:$0x3] }
  0x21   :  { %s269_s27 = sld [smem:[#allocation2 + $0x200]]  ;;  %s295_s13 = sld [smem:[#allocation2 + $0x201]]  ;;  %v158_v13 = vld [vmem:[%s363_s2 + $0x5] ss:$8 sm:$0x3] }
  0x22   :  { %s274_s30 = sld [smem:[#allocation2 + $0x280]]  ;;  %v52_v4 = vstv %s51_s1  ;;  %s297_s14 = sld [smem:[#allocation2 + $0x281]]  ;;  %v83_v19 = vstv %s276_s4 }
  0x23   :  { %v55_v5 = vstv %s262_s21  ;;  %v53_v7 = vmul.f32 %v52_v4, %v40_v0  ;;  %s302_s17 = sld [smem:[#allocation2 + $0x2]]  ;;  %v86_v20 = vstv %s281_s7  ;;  %v84_v23 = vmul.f32 %v83_v19, %v40_v0 }
  0x24   :  { %v58_v8 = vstv %s159_s22  ;;  %s304_s18 = sld [smem:[#allocation5 + $0x2]]  ;;  %v89_v21 = vstv %s283_s8 }
  0x25   :  { %v62_v9 = vstv %s160_s23  ;;  %v59_v10 = vmul.f32 %v154_v1, %v58_v8  ;;  %s307_s19 = sld [smem:[#allocation2 + $0x82]]  ;;  %v56_v14 = vadd.f32 %v55_v5, %v53_v7  ;;  %v90_v24 = vmul.f32 %v154_v1, %v89_v21  ;;  %s235_s23 = smov [#allocation7]  }
  0x26   :  { %v66_v11 = vstv %s267_s26  ;;  %s309_s20 = sld [smem:[#allocation2 + $0x102]]  ;;  %v63_v15 = vmul.f32 %v155_v2, %v62_v9  ;;  %v93_v25 = vstv %s290_s11  ;;  %v97_v29 = vstv %s292_s12  ;;  %s144_s24 = sshll.u32 %s235_s23, 4  ;;  %s145_s24 = int_to_ptr.vmem [resolvable:$true] %s144_s24 }
  0x27   :  { %v70_v16 = vstv %s269_s27  ;;  %s316_s21 = sld [smem:[#allocation2 + $0x182]]  ;;  %v67_v18 = vmul.f32 %v288_v3, %v66_v11  ;;  %v60_v22 = vadd.f32 %v59_v10, %v56_v14  ;;  %v94_v28 = vmul.f32 %v155_v2, %v93_v25  ;;  %s205_s25 = scalar_lea.vmem %s145_s24, 128 }
  0x28   :  { %v74_v17 = vstv %s274_s30  ;;  %s322_s22 = sld [smem:[#allocation2 + $0x202]]  ;;  %v71_v26 = vmul.f32 %v157_v6, %v70_v16  ;;  %v87_v31 = vadd.f32 %v86_v20, %v84_v23  ;;  %v101_v32 = vstv %s295_s13  ;;  %p206_p10 = scmp.ne.s32.totalorder %s145_s24, %s205_s25 }
  0x29   :  { %v75_v27 = vmul.f32 %v158_v13, %v74_v17  ;;  %s326_s2 = sld [smem:[#allocation2 + $0x282]]  ;;  %v64_v30 = vadd.f32 %v63_v15, %v60_v22  ;;  %v105_v33 = vstv %s297_s14  ;;  %v98_v34 = vmul.f32 %v288_v3, %v97_v29  ;;  %p210_p11 = scmp.lt.s32.totalorder %s145_s24, %s145_s24 }
  0x2a   :  { %v111_v35 = vstv %s302_s17  ;;  %v114_v36 = vstv %s304_s18  ;;  %v91_v39 = vadd.f32 %v90_v24, %v87_v31  ;;  %v102_v42 = vmul.f32 %v157_v6, %v101_v32  ;;  %p211_p12 = scmp.lt.s32.totalorder %s205_s25, %s205_s25 }
  0x2b   :  { %v117_v37 = vstv %s307_s19  ;;  %v68_v38 = vadd.f32 %v67_v18, %v64_v30  ;;  %v112_v40 = vmul.f32 %v111_v35, %v40_v0  ;;  %v106_v50 = vmul.f32 %v158_v13, %v105_v33 }
  0x2c   :  { %v118_v41 = vmul.f32 %v154_v1, %v117_v37  ;;  %v121_v43 = vstv %s309_s20  ;;  %v95_v46 = vadd.f32 %v94_v28, %v91_v39  ;;  %p212_p13 = por %p211_p12, %p210_p11 }
  0x2d   :  { %v125_v44 = vstv %s316_s21  ;;  %v72_v45 = vadd.f32 %v71_v26, %v68_v38  ;;  %v115_v47 = vadd.f32 %v114_v36, %v112_v40  ;;  %v122_v48 = vmul.f32 %v155_v2, %v121_v43 }
  0x2e   :  { %v129_v51 = vstv %s322_s22  ;;  %v99_v53 = vadd.f32 %v98_v34, %v95_v46  ;;  %v126_v55 = vmul.f32 %v288_v3, %v125_v44  ;;  %p213_p0 = pnand %p212_p13, %p206_p10 }
  0x2f   :  { %v76_v52 = vadd.f32 %v75_v27, %v72_v45  ;;  %v119_v54 = vadd.f32 %v118_v41, %v115_v47  ;;  %v133_v56 = vstv %s326_s2  ;;  %v130_v59 = vmul.f32 %v157_v6, %v129_v51 }
  0x30   :  { %v103_v57 = vadd.f32 %v102_v42, %v99_v53  ;;  %v134_v62 = vmul.f32 %v158_v13, %v133_v56 }
  0x31   :  { %81 = vst.msk [vmem:[#allocation7] ss:$4 sm:$0x3] %vm336_vm0, %v76_v52  ;;  %v123_v58 = vadd.f32 %v122_v48, %v119_v54 }
  0x32   :  { %v107_v60 = vadd.f32 %v106_v50, %v103_v57 }
  0x33   :  { %v127_v61 = vadd.f32 %v126_v55, %v123_v58 }
  0x34   :  { %109 = vst.msk [vmem:[#allocation7 + $0x1] ss:$4 sm:$0x3] %vm336_vm0, %v107_v60 }
  0x35   :  { %v131_v63 = vadd.f32 %v130_v59, %v127_v61 }
  0x37   :  { %v135_v0 = vadd.f32 %v134_v62, %v131_v63 }
  0x39   :  { %137 = vst.msk [vmem:[#allocation7 + $0x2] ss:$4 sm:$0x3] %vm336_vm0, %v135_v0 }
  0x3a   :  { %216 = shalt.err (!%p213_p0)
}
  0x3b   :  { %s217_s28 = scalar_lea.hbm %s364_s3, 128 }
  0x3c   :  { %p218_p1 = scmp.ne.s32.totalorder %s364_s3, %s217_s28  ;;  %p221_p2 = scmp.lt.u32.totalorder %s217_s28, %s364_s3 }
  0x3e   :  { %p223_p3 = pnand %p221_p2, %p218_p1 }
  0x40   :  { %226 = shalt.err (!%p223_p3)
}
  0x41   :  { %147 = dma.vmem_to_hbm [thread:$0]  %s145_s24, 128, %s364_s3, [#allocation3]  }
  0x42   :  { %231 = dma.done.wait [#allocation3], 128  }
  0x43   :  { %232 = vsyncadd [#allocation3], 4294967168 }
  0x44   :  { %151 = vsyncpa [#allocation3], 1 }
  0x45   :  { %152 = vsyncpa [#allocation4], 1 }
  0x46   :  { %153 = vsyncpa [#allocation6], 1 }

</bundles_post_ra>
